<compile_context>
chip_gen: v7x
topology: tpu7x:2x2x1
jax: 0.10.0
libtpu: 0.0.40
codegen_flags: <defaults>
</compile_context>

<pallas_src>
import numpy as np
import jax
import jax.numpy as jnp
from jax.experimental import pallas as pl
from jax.experimental.pallas import tpu as pltpu

F32_EPS = float(np.finfo(np.float32).eps)


# ----------------------------------------------------------------------------
# Hardware-aware sizing helpers
# ----------------------------------------------------------------------------
def _vmem_capacity_bytes():
    try:
        cap = getattr(pltpu.get_tpu_info(), "vmem_capacity_bytes", None)
        if cap:
            return int(cap)
    except Exception:
        pass
    return 64 * 1024 * 1024          # conservative (v7x) default


def _pick_hw_tile(hw_padded, max_block_bytes, c, itemsize):
    """Largest multiple-of-128 divisor of hw_padded within the byte budget."""
    cap_lanes = max(128, (max_block_bytes // (itemsize * c)) // 128 * 128)
    cap_lanes = min(cap_lanes, hw_padded)
    tile = 128
    for cand in range(cap_lanes, 127, -128):
        if hw_padded % cand == 0:
            tile = cand
            break
    return tile


# ----------------------------------------------------------------------------
# Shared per-channel math (works on (C,) or (C,1) arrays, in-kernel or in JAX)
# ----------------------------------------------------------------------------
def _roll_half_small(v, d_r):
    # [real; imag] -> [imag; real] along axis 0, for tiny per-channel vectors.
    return jnp.concatenate([v[d_r:], v[:d_r]], axis=0)


def _whitening_coeffs(s_x, s_xx, s_xc, g_self, g_cross, beta, inv_m, eps, d_r):
    """Whitening + gamma/beta folding from raw sums.

    Returns mean, v_self=[Vrr;Vii], v_cross=[Vri;Vri] and fused affine
    coefficients such that  y = coeff_self*x + coeff_roll*roll(x) + bias.
    """
    roll = lambda v: _roll_half_small(v, d_r)
    mean = s_x * inv_m                                  # [mu_r; mu_i]
    mean_rolled = roll(mean)
    v_self = s_xx * inv_m - mean * mean + eps           # [Vrr; Vii]
    v_cross = s_xc * inv_m - mean * mean_rolled         # [Vri; Vri]
    v_self_rolled = roll(v_self)                        # [Vii; Vrr]

    tau = v_self + v_self_rolled
    delta = v_self * v_self_rolled - v_cross * v_cross
    s = jnp.sqrt(delta + F32_EPS)
    t = jnp.sqrt(tau + 2.0 * s + F32_EPS)
    inv_st = 1.0 / (s * t + F32_EPS)
    w_self = (v_self_rolled + s) * inv_st               # [Wrr; Wii]
    w_cross = -v_cross * inv_st                         # [Wri; Wri]

    coeff_self = g_self * w_self + g_cross * w_cross
    coeff_roll = g_self * w_cross + g_cross * roll(w_self)
    bias = beta - coeff_self * mean - coeff_roll * mean_rolled
    return mean, v_self, v_cross, coeff_self, coeff_roll, bias


# ----------------------------------------------------------------------------
# Pass 1: per-channel partial sums of {x, x^2, x*roll_half(x)}
# ----------------------------------------------------------------------------
def _make_stats_kernel(d_r):
    C = 2 * d_r

    def kernel(x_ref, part_ref):
        @pl.when(pl.program_id(1) == 0)
        def _init():
            part_ref[...] = jnp.zeros_like(part_ref)

        x = x_ref[0].astype(jnp.float32)                 # (C, hw_tile)
        x_rolled = pltpu.roll(x, shift=d_r, axis=0)      # XLU sublane rotate
        s_x = jnp.sum(x, axis=1, keepdims=True)          # (C, 1)
        s_xx = jnp.sum(x * x, axis=1, keepdims=True)
        s_xc = jnp.sum(x * x_rolled, axis=1, keepdims=True)
        upd = jnp.concatenate(
            [s_x, s_xx, s_xc, jnp.zeros((C, 5), jnp.float32)], axis=1)
        part_ref[0] = part_ref[0] + upd                  # tiny resident acc

    return kernel


# ----------------------------------------------------------------------------
# Pass 2: y = coeff_self*x + coeff_roll*roll_half(x) + bias
# ----------------------------------------------------------------------------
def _make_norm_kernel(d_r):
    def kernel(coeff_ref, x_ref, y_ref):
        c = coeff_ref[...]                               # (C, 8), resident
        x = x_ref[0].astype(jnp.float32)                 # (C, hw_tile)
        x_rolled = pltpu.roll(x, shift=d_r, axis=0)
        y = c[:, 0:1] * x + c[:, 1:2] * x_rolled + c[:, 2:3]
        y_ref[0] = y.astype(y_ref.dtype)

    return kernel


# ----------------------------------------------------------------------------
# Fused small-activation path: stats + whitening + normalize in one call
# ----------------------------------------------------------------------------
def _make_fused_kernel(n_batch, d_r, eps, inv_m):
    C = 2 * d_r

    def kernel(params_ref, x_ref, y_ref, stats_ref):
        s_x = jnp.zeros((C, 1), jnp.float32)
        s_xx = jnp.zeros((C, 1), jnp.float32)
        s_xc = jnp.zeros((C, 1), jnp.float32)
        for n in range(n_batch):                          # static unroll
            xp = x_ref[n].astype(jnp.float32)             # (C, HWp)
            xr = pltpu.roll(xp, shift=d_r, axis=0)
            s_x = s_x + jnp.sum(xp, axis=1, keepdims=True)
            s_xx = s_xx + jnp.sum(xp * xp, axis=1, keepdims=True)
            s_xc = s_xc + jnp.sum(xp * xr, axis=1, keepdims=True)

        p = params_ref[...]                               # (C, 8)
        mean, v_self, v_cross, coeff_self, coeff_roll, bias = _whitening_coeffs(
            s_x, s_xx, s_xc, p[:, 0:1], p[:, 1:2], p[:, 2:3], inv_m, eps, d_r)

        for n in range(n_batch):
            xp = x_ref[n].astype(jnp.float32)
            xr = pltpu.roll(xp, shift=d_r, axis=0)
            y_ref[n] = (coeff_self * xp + coeff_roll * xr + bias).astype(
                y_ref.dtype)

        stats_ref[...] = jnp.concatenate(
            [mean, v_self, v_cross, jnp.zeros((C, 5), jnp.float32)], axis=1)

    return kernel


# ----------------------------------------------------------------------------
# Wrapper
# ----------------------------------------------------------------------------
def complex_batch_norm(x, gamma_rr, gamma_ii, gamma_ri, beta, eps=1e-4,
                       use_fused=None, max_block_bytes=None):
    """Training-mode forward of ComplexBatchNormalization.

    x: (N, 2*d_r, H, W), NCHW (same convention as the PyTorch module).
    Returns (out, batch_stats); batch_stats carries the per-channel batch
    mean / Vrr / Vii / Vri used for the running-average buffer updates.
    """
    N, C, H, W = x.shape
    d_r = C // 2
    HW = H * W
    inv_m = 1.0 / float(N * HW)
    itemsize = np.dtype(x.dtype).itemsize

    vmem_cap = _vmem_capacity_bytes()
    vmem_limit = int(min(vmem_cap * 3 // 4, 96 * 1024 * 1024))
    if max_block_bytes is None:
        max_block_bytes = int(min(8 * 1024 * 1024, vmem_cap // 16))

    # lane-dense layout: channels on sublanes, (padded) H*W on lanes
    HWp = ((HW + 127) // 128) * 128
    x3 = x.reshape(N, C, HW)                              # free reshape
    if HWp != HW:
        # TODO(synk): a masked tail tile (pl.cdiv grid) would avoid this copy.
        x3 = jnp.pad(x3, ((0, 0), (0, 0), (0, HWp - HW)))

    g_self = jnp.concatenate([gamma_rr, gamma_ii]).astype(jnp.float32)   # (C,)
    g_cross = jnp.concatenate([gamma_ri, gamma_ri]).astype(jnp.float32)
    beta32 = beta.astype(jnp.float32)

    if use_fused is None:
        use_fused = (N * C * HWp * 4 * 6 <= vmem_limit) and (N <= 64)

    if use_fused:
        params = jnp.stack(
            [g_self, g_cross, beta32] + [jnp.zeros((C,), jnp.float32)] * 5,
            axis=1)                                                     # (C, 8)
        y3, stats_tile = pl.pallas_call(
            _make_fused_kernel(N, d_r, float(eps), inv_m),
            out_shape=(jax.ShapeDtypeStruct((N, C, HWp), x.dtype),
                       jax.ShapeDtypeStruct((C, 8), jnp.float32)),
            grid=(1,),
            in_specs=[pl.BlockSpec((C, 8), lambda i: (0, 0)),
                      pl.BlockSpec((N, C, HWp), lambda i: (0, 0, 0))],
            out_specs=(pl.BlockSpec((N, C, HWp), lambda i: (0, 0, 0)),
                       pl.BlockSpec((C, 8), lambda i: (0, 0))),
            compiler_params=pltpu.CompilerParams(
                dimension_semantics=("arbitrary",),
                vmem_limit_bytes=vmem_limit),
        )(params, x3)
        mean = stats_tile[:, 0]
        v_self = stats_tile[:, 1]
        v_cross = stats_tile[:, 2]
    else:
        hw_tile = _pick_hw_tile(HWp, max_block_bytes, C, itemsize)
        n_tiles = HWp // hw_tile

        # ---- pass 1: partial sums over (parallel groups) x (reduction) ----
        if N == 1 and n_tiles % 2 == 0 and n_tiles >= 2:
            n_par, n_arb = 2, n_tiles // 2        # 2-way HW split (megacore)
            x_map = lambda g, t: (0, 0, g * (n_tiles // 2) + t)
        else:
            n_par, n_arb = N, n_tiles
            x_map = lambda g, t: (g, 0, t)

        partials = pl.pallas_call(
            _make_stats_kernel(d_r),
            out_shape=jax.ShapeDtypeStruct((n_par, C, 8), jnp.float32),
            grid=(n_par, n_arb),
            in_specs=[pl.BlockSpec((1, C, hw_tile), x_map)],
            out_specs=pl.BlockSpec((1, C, 8), lambda g, t: (g, 0, 0)),
            compiler_params=pltpu.CompilerParams(
                dimension_semantics=("parallel", "arbitrary"),
                vmem_limit_bytes=vmem_limit),
        )(x3)

        # tiny whitening / coefficient math in plain JAX
        sums = jnp.sum(partials, axis=0)                   # (C, 8)
        mean, v_self, v_cross, coeff_self, coeff_roll, bias = _whitening_coeffs(
            sums[:, 0], sums[:, 1], sums[:, 2], g_self, g_cross, beta32,
            inv_m, float(eps), d_r)
        coeffs = jnp.stack(
            [coeff_self, coeff_roll, bias] + [jnp.zeros((C,), jnp.float32)] * 5,
            axis=1)                                        # (C, 8)

        # ---- pass 2: apply fused per-channel affine (fully parallel) ----
        x_spec = pl.BlockSpec((1, C, hw_tile), lambda n, t: (n, 0, t))
        y3 = pl.pallas_call(
            _make_norm_kernel(d_r),
            out_shape=jax.ShapeDtypeStruct((N, C, HWp), x.dtype),
            grid=(N, n_tiles),
            in_specs=[pl.BlockSpec((C, 8), lambda n, t: (0, 0)), x_spec],
            out_specs=x_spec,
            compiler_params=pltpu.CompilerParams(
                dimension_semantics=("parallel", "parallel"),
                vmem_limit_bytes=vmem_limit),
        )(coeffs, x3)

    out = y3[:, :, :HW].reshape(N, C, H, W)
    batch_stats = dict(
        mean=mean,                   # (2*d_r,) = [mean_r ; mean_i]
        vrr=v_self[:d_r],            # eps already added (matches the module)
        vii=v_self[d_r:],
        vri=v_cross[:d_r],
    )
    return out, batch_stats


def update_running_stats(stats, avg_mean, avg_vrr, avg_vii, avg_vri, decay=0.9):
    # glue: EMA buffer updates (the PyTorch module mutates registered buffers;
    # here they are carried functionally).
    avg_mean = decay * avg_mean + (1.0 - decay) * stats["mean"]
    avg_vrr = decay * avg_vrr + (1.0 - decay) * stats["vrr"]
    avg_vii = decay * avg_vii + (1.0 - decay) * stats["vii"]
    avg_vri = decay * avg_vri + (1.0 - decay) * stats["vri"]
    return avg_mean, avg_vrr, avg_vii, avg_vri


def reference_forward(x, gamma_rr, gamma_ii, gamma_ri, beta, eps=1e-4):
    """Pure-JAX mirror of the PyTorch training-mode forward, for validation."""
    d_r = x.shape[1] // 2
    mean = jnp.mean(x, axis=(0, 2, 3), keepdims=True)
    xc = x - mean
    cr = xc[:, :d_r]
    ci = xc[:, d_r:]
    vrr = jnp.mean(cr * cr, axis=(0, 2, 3), keepdims=True) + eps
    vii = jnp.mean(ci * ci, axis=(0, 2, 3), keepdims=True) + eps
    vri = jnp.mean(cr * ci, axis=(0, 2, 3), keepdims=True)
    tau = vrr + vii
    delta = vrr * vii - vri ** 2.0
    s = jnp.sqrt(delta + F32_EPS)
    t = jnp.sqrt(tau + 2.0 * s + F32_EPS)
    inv_st = 1.0 / (s * t + F32_EPS)
    wrr = (vii + s) * inv_st
    wii = (vrr + s) * inv_st
    wri = -vri * inv_st
    cat_w_real = jnp.concatenate([wrr, wii], axis=1)
    cat_w_imag = jnp.concatenate([wri, wri], axis=1)
    rolled_x = jnp.concatenate([ci, cr], axis=1)
    xs = cat_w_real * xc + cat_w_imag * rolled_x
    xsr = xs[:, :d_r]
    xsi = xs[:, d_r:]
    rolled_xs = jnp.concatenate([xsi, xsr], axis=1)
    g_real = jnp.concatenate(
        [jnp.broadcast_to(gamma_rr.reshape(1, d_r, 1, 1), xsr.shape),
         jnp.broadcast_to(gamma_ii.reshape(1, d_r, 1, 1), xsr.shape)], axis=1)
    g_imag = jnp.concatenate(
        [jnp.broadcast_to(gamma_ri.reshape(1, d_r, 1, 1), xsr.shape)] * 2, axis=1)
    out = g_real * xs + g_imag * rolled_xs
    out = out + beta.reshape(1, 2 * d_r, 1, 1)
    return out


if __name__ == "__main__":
    N, d_r, H, W = 2, 4, 16, 16
    key = jax.random.PRNGKey(0)
    x = jax.random.normal(key, (N, 2 * d_r, H, W), dtype=jnp.float32)

    # parameters exactly as in the module's __init__ defaults
    gamma_rr = jnp.ones((d_r,), jnp.float32) / 2.0 ** 0.5
    gamma_ii = jnp.ones((d_r,), jnp.float32) / 2.0 ** 0.5
    gamma_ri = jnp.ones((d_r,), jnp.float32)
    beta = jnp.zeros((2 * d_r,), jnp.float32)

    # running-stat buffers (defaults)
    avg_mean = jnp.zeros((2 * d_r,), jnp.float32)
    avg_vrr = jnp.ones((d_r,), jnp.float32) / 2.0 ** 0.5
    avg_vii = jnp.ones((d_r,), jnp.float32) / 2.0 ** 0.5
    avg_vri = jnp.zeros((d_r,), jnp.float32)

    # references
    ref = reference_forward(x, gamma_rr, gamma_ii, gamma_ri, beta, eps=1e-4)
    mean_ref = jnp.mean(x, axis=(0, 2, 3))
    xc = x - mean_ref.reshape(1, -1, 1, 1)
    vrr_ref = jnp.mean(xc[:, :d_r] ** 2, axis=(0, 2, 3)) + 1e-4
    vii_ref = jnp.mean(xc[:, d_r:] ** 2, axis=(0, 2, 3)) + 1e-4
    vri_ref = jnp.mean(xc[:, :d_r] * xc[:, d_r:], axis=(0, 2, 3))

    def check(out, stats):
        np.testing.assert_allclose(np.asarray(out), np.asarray(ref),
                                   rtol=5e-5, atol=5e-5)
        np.testing.assert_allclose(np.asarray(stats["mean"]),
                                   np.asarray(mean_ref), rtol=5e-5, atol=5e-5)
        np.testing.assert_allclose(np.asarray(stats["vrr"]),
                                   np.asarray(vrr_ref), rtol=5e-5, atol=5e-5)
        np.testing.assert_allclose(np.asarray(stats["vii"]),
                                   np.asarray(vii_ref), rtol=5e-5, atol=5e-5)
        np.testing.assert_allclose(np.asarray(stats["vri"]),
                                   np.asarray(vri_ref), rtol=5e-5, atol=5e-5)

    # 1) fused small-activation fast path (x stays resident in VMEM, 1R + 1W)
    out_f, stats_f = complex_batch_norm(x, gamma_rr, gamma_ii, gamma_ri, beta,
                                        eps=1e-4, use_fused=True)
    out_f = jax.block_until_ready(out_f)
    check(out_f, stats_f)

    # 2) two-pass streaming path, forced to small blocks so the tiled
    #    partial-sum accumulation and both streaming kernels are exercised.
    out_t, stats_t = complex_batch_norm(
        x, gamma_rr, gamma_ii, gamma_ri, beta, eps=1e-4,
        use_fused=False, max_block_bytes=2 * d_r * 128 * 4)
    out_t = jax.block_until_ready(out_t)
    check(out_t, stats_t)

    # buffer EMA updates (side effect in the PyTorch module) done in glue JAX
    avg_mean, avg_vrr, avg_vii, avg_vri = update_running_stats(
        stats_t, avg_mean, avg_vrr, avg_vii, avg_vri, decay=0.9)
    jax.block_until_ready(avg_mean)

    print("KERNEL_OK")
</pallas_src>

<mosaic_0001>
module attributes {stable_mosaic.version = 11 : i64} {
  func.func @kernel(%arg0: i32, %arg1: memref<8x8xf32, #tpu.memory_space<vmem>>, %arg2: memref<2x8x256xf32, #tpu.memory_space<vmem>>, %arg3: memref<2x8x256xf32, #tpu.memory_space<vmem>>, %arg4: memref<8x8xf32, #tpu.memory_space<vmem>>) attributes {dimension_semantics = [#tpu.dimension_semantics<arbitrary>], iteration_bounds = array<i64: 1>, scalar_prefetch = 0 : i64, scratch_operands = 0 : i64, tpu.core_type = #tpu.core_type<tc>, window_params = [{pipeline_mode = #tpu.pipeline_mode<synchronous>, transform_indices = @transform_0, window_bounds = array<i64: 8, 8>}, {pipeline_mode = #tpu.pipeline_mode<synchronous>, transform_indices = @transform_1, window_bounds = array<i64: 2, 8, 256>}, {pipeline_mode = #tpu.pipeline_mode<synchronous>, transform_indices = @transform_2, window_bounds = array<i64: 2, 8, 256>}, {pipeline_mode = #tpu.pipeline_mode<synchronous>, transform_indices = @transform_3, window_bounds = array<i64: 8, 8>}]} {
    %cst = arith.constant 0.000000e+00 : f32
    %0 = vector.broadcast %cst : f32 to vector<8x1xf32>
    %cst_0 = arith.constant 0.000000e+00 : f32
    %1 = vector.broadcast %cst_0 : f32 to vector<8x1xf32>
    %cst_1 = arith.constant 0.000000e+00 : f32
    %2 = vector.broadcast %cst_1 : f32 to vector<8x1xf32>
    %c0 = arith.constant 0 : index
    %c0_2 = arith.constant 0 : index
    %c0_3 = arith.constant 0 : index
    %3 = vector.load %arg2[%c0, %c0_2, %c0_3] : memref<2x8x256xf32, #tpu.memory_space<vmem>>, vector<1x8x256xf32>
    %4 = vector.shape_cast %3 : vector<1x8x256xf32> to vector<8x256xf32>
    %c4_i32 = arith.constant 4 : i32
    %5 = tpu.dynamic_rotate %4 by %c4_i32 dim 0 : vector<8x256xf32>, i32 -> vector<8x256xf32>
    %cst_4 = arith.constant dense<0.000000e+00> : vector<8xf32>
    %6 = vector.multi_reduction <add>, %4, %cst_4 [1] : vector<8x256xf32> to vector<8xf32>
    %7 = vector.shape_cast %6 : vector<8xf32> to vector<8x1xf32>
    %8 = arith.addf %0, %7 : vector<8x1xf32>
    %9 = arith.mulf %4, %4 : vector<8x256xf32>
    %cst_5 = arith.constant dense<0.000000e+00> : vector<8xf32>
    %10 = vector.multi_reduction <add>, %9, %cst_5 [1] : vector<8x256xf32> to vector<8xf32>
    %11 = vector.shape_cast %10 : vector<8xf32> to vector<8x1xf32>
    %12 = arith.addf %1, %11 : vector<8x1xf32>
    %13 = arith.mulf %4, %5 : vector<8x256xf32>
    %cst_6 = arith.constant dense<0.000000e+00> : vector<8xf32>
    %14 = vector.multi_reduction <add>, %13, %cst_6 [1] : vector<8x256xf32> to vector<8xf32>
    %15 = vector.shape_cast %14 : vector<8xf32> to vector<8x1xf32>
    %16 = arith.addf %2, %15 : vector<8x1xf32>
    %c1 = arith.constant 1 : index
    %c0_7 = arith.constant 0 : index
    %c0_8 = arith.constant 0 : index
    %17 = vector.load %arg2[%c1, %c0_7, %c0_8] : memref<2x8x256xf32, #tpu.memory_space<vmem>>, vector<1x8x256xf32>
    %18 = vector.shape_cast %17 : vector<1x8x256xf32> to vector<8x256xf32>
    %c4_i32_9 = arith.constant 4 : i32
    %19 = tpu.dynamic_rotate %18 by %c4_i32_9 dim 0 : vector<8x256xf32>, i32 -> vector<8x256xf32>
    %cst_10 = arith.constant dense<0.000000e+00> : vector<8xf32>
    %20 = vector.multi_reduction <add>, %18, %cst_10 [1] : vector<8x256xf32> to vector<8xf32>
    %21 = vector.shape_cast %20 : vector<8xf32> to vector<8x1xf32>
    %22 = arith.addf %8, %21 : vector<8x1xf32>
    %23 = arith.mulf %18, %18 : vector<8x256xf32>
    %cst_11 = arith.constant dense<0.000000e+00> : vector<8xf32>
    %24 = vector.multi_reduction <add>, %23, %cst_11 [1] : vector<8x256xf32> to vector<8xf32>
    %25 = vector.shape_cast %24 : vector<8xf32> to vector<8x1xf32>
    %26 = arith.addf %12, %25 : vector<8x1xf32>
    %27 = arith.mulf %18, %19 : vector<8x256xf32>
    %cst_12 = arith.constant dense<0.000000e+00> : vector<8xf32>
    %28 = vector.multi_reduction <add>, %27, %cst_12 [1] : vector<8x256xf32> to vector<8xf32>
    %29 = vector.shape_cast %28 : vector<8xf32> to vector<8x1xf32>
    %30 = arith.addf %16, %29 : vector<8x1xf32>
    %c0_13 = arith.constant 0 : index
    %c0_14 = arith.constant 0 : index
    %31 = vector.load %arg1[%c0_13, %c0_14] : memref<8x8xf32, #tpu.memory_space<vmem>>, vector<8x8xf32>
    %32 = vector.extract_strided_slice %31 {offsets = [0, 0], sizes = [8, 1], strides = [1, 1]} : vector<8x8xf32> to vector<8x1xf32>
    %33 = vector.extract_strided_slice %31 {offsets = [0, 1], sizes = [8, 1], strides = [1, 1]} : vector<8x8xf32> to vector<8x1xf32>
    %34 = vector.extract_strided_slice %31 {offsets = [0, 2], sizes = [8, 1], strides = [1, 1]} : vector<8x8xf32> to vector<8x1xf32>
    %cst_15 = arith.constant 0.001953125 : f32
    %35 = vector.broadcast %cst_15 : f32 to vector<8x1xf32>
    %36 = arith.mulf %22, %35 : vector<8x1xf32>
    %37 = vector.extract_strided_slice %36 {offsets = [4, 0], sizes = [4, 1], strides = [1, 1]} : vector<8x1xf32> to vector<4x1xf32>
    %38 = vector.extract_strided_slice %36 {offsets = [0, 0], sizes = [4, 1], strides = [1, 1]} : vector<8x1xf32> to vector<4x1xf32>
    %39 = tpu.concatenate %37, %38 in 0 : vector<4x1xf32>, vector<4x1xf32> -> vector<8x1xf32>
    %cst_16 = arith.constant 0.001953125 : f32
    %40 = vector.broadcast %cst_16 : f32 to vector<8x1xf32>
    %41 = arith.mulf %26, %40 : vector<8x1xf32>
    %42 = arith.mulf %36, %36 : vector<8x1xf32>
    %43 = arith.subf %41, %42 : vector<8x1xf32>
    %cst_17 = arith.constant 9.99999974E-5 : f32
    %44 = vector.broadcast %cst_17 : f32 to vector<8x1xf32>
    %45 = arith.addf %43, %44 : vector<8x1xf32>
    %cst_18 = arith.constant 0.001953125 : f32
    %46 = vector.broadcast %cst_18 : f32 to vector<8x1xf32>
    %47 = arith.mulf %30, %46 : vector<8x1xf32>
    %48 = arith.mulf %36, %39 : vector<8x1xf32>
    %49 = arith.subf %47, %48 : vector<8x1xf32>
    %50 = vector.extract_strided_slice %45 {offsets = [4, 0], sizes = [4, 1], strides = [1, 1]} : vector<8x1xf32> to vector<4x1xf32>
    %51 = vector.extract_strided_slice %45 {offsets = [0, 0], sizes = [4, 1], strides = [1, 1]} : vector<8x1xf32> to vector<4x1xf32>
    %52 = tpu.concatenate %50, %51 in 0 : vector<4x1xf32>, vector<4x1xf32> -> vector<8x1xf32>
    %53 = arith.addf %45, %52 : vector<8x1xf32>
    %54 = arith.mulf %45, %52 : vector<8x1xf32>
    %55 = arith.mulf %49, %49 : vector<8x1xf32>
    %56 = arith.subf %54, %55 : vector<8x1xf32>
    %cst_19 = arith.constant 1.1920929E-7 : f32
    %57 = vector.broadcast %cst_19 : f32 to vector<8x1xf32>
    %58 = arith.addf %56, %57 : vector<8x1xf32>
    %59 = math.sqrt %58 : vector<8x1xf32>
    %cst_20 = arith.constant 2.000000e+00 : f32
    %60 = vector.broadcast %cst_20 : f32 to vector<8x1xf32>
    %61 = arith.mulf %60, %59 : vector<8x1xf32>
    %62 = arith.addf %53, %61 : vector<8x1xf32>
    %cst_21 = arith.constant 1.1920929E-7 : f32
    %63 = vector.broadcast %cst_21 : f32 to vector<8x1xf32>
    %64 = arith.addf %62, %63 : vector<8x1xf32>
    %65 = math.sqrt %64 : vector<8x1xf32>
    %66 = arith.mulf %59, %65 : vector<8x1xf32>
    %cst_22 = arith.constant 1.1920929E-7 : f32
    %67 = vector.broadcast %cst_22 : f32 to vector<8x1xf32>
    %68 = arith.addf %66, %67 : vector<8x1xf32>
    %cst_23 = arith.constant 1.000000e+00 : f32
    %69 = vector.broadcast %cst_23 : f32 to vector<8x1xf32>
    %70 = arith.divf %69, %68 : vector<8x1xf32>
    %71 = arith.addf %52, %59 : vector<8x1xf32>
    %72 = arith.mulf %71, %70 : vector<8x1xf32>
    %cst_24 = arith.constant 0.000000e+00 : f32
    %73 = vector.broadcast %cst_24 : f32 to vector<8x1xf32>
    %74 = arith.subf %73, %49 : vector<8x1xf32>
    %75 = arith.mulf %74, %70 : vector<8x1xf32>
    %76 = arith.mulf %32, %72 : vector<8x1xf32>
    %77 = arith.mulf %33, %75 : vector<8x1xf32>
    %78 = arith.addf %76, %77 : vector<8x1xf32>
    %79 = arith.mulf %32, %75 : vector<8x1xf32>
    %80 = vector.extract_strided_slice %72 {offsets = [4, 0], sizes = [4, 1], strides = [1, 1]} : vector<8x1xf32> to vector<4x1xf32>
    %81 = vector.extract_strided_slice %72 {offsets = [0, 0], sizes = [4, 1], strides = [1, 1]} : vector<8x1xf32> to vector<4x1xf32>
    %82 = tpu.concatenate %80, %81 in 0 : vector<4x1xf32>, vector<4x1xf32> -> vector<8x1xf32>
    %83 = arith.mulf %33, %82 : vector<8x1xf32>
    %84 = arith.addf %79, %83 : vector<8x1xf32>
    %85 = arith.mulf %78, %36 : vector<8x1xf32>
    %86 = arith.subf %34, %85 : vector<8x1xf32>
    %87 = arith.mulf %84, %39 : vector<8x1xf32>
    %88 = arith.subf %86, %87 : vector<8x1xf32>
    %c0_25 = arith.constant 0 : index
    %c0_26 = arith.constant 0 : index
    %c0_27 = arith.constant 0 : index
    %89 = vector.load %arg2[%c0_25, %c0_26, %c0_27] : memref<2x8x256xf32, #tpu.memory_space<vmem>>, vector<1x8x256xf32>
    %90 = vector.shape_cast %89 : vector<1x8x256xf32> to vector<8x256xf32>
    %c4_i32_28 = arith.constant 4 : i32
    %91 = tpu.dynamic_rotate %90 by %c4_i32_28 dim 0 : vector<8x256xf32>, i32 -> vector<8x256xf32>
    %92 = vector.broadcast %78 : vector<8x1xf32> to vector<8x256xf32>
    %93 = arith.mulf %92, %90 : vector<8x256xf32>
    %94 = vector.broadcast %84 : vector<8x1xf32> to vector<8x256xf32>
    %95 = arith.mulf %94, %91 : vector<8x256xf32>
    %96 = arith.addf %93, %95 : vector<8x256xf32>
    %97 = vector.broadcast %88 : vector<8x1xf32> to vector<8x256xf32>
    %98 = arith.addf %96, %97 : vector<8x256xf32>
    %c0_29 = arith.constant 0 : index
    %c0_30 = arith.constant 0 : index
    %c0_31 = arith.constant 0 : index
    %99 = vector.load %arg3[%c0_29, %c0_30, %c0_31] : memref<2x8x256xf32, #tpu.memory_space<vmem>>, vector<1x8x256xf32>
    %100 = vector.shape_cast %99 : vector<1x8x256xf32> to vector<8x256xf32>
    %101 = vector.shape_cast %98 : vector<8x256xf32> to vector<1x8x256xf32>
    tpu.vector_store %arg3[%c0_29, %c0_30, %c0_31], %101 {strides = array<i32>} : memref<2x8x256xf32, #tpu.memory_space<vmem>>, vector<1x8x256xf32>,
    %c1_32 = arith.constant 1 : index
    %c0_33 = arith.constant 0 : index
    %c0_34 = arith.constant 0 : index
    %102 = vector.load %arg2[%c1_32, %c0_33, %c0_34] : memref<2x8x256xf32, #tpu.memory_space<vmem>>, vector<1x8x256xf32>
    %103 = vector.shape_cast %102 : vector<1x8x256xf32> to vector<8x256xf32>
    %c4_i32_35 = arith.constant 4 : i32
    %104 = tpu.dynamic_rotate %103 by %c4_i32_35 dim 0 : vector<8x256xf32>, i32 -> vector<8x256xf32>
    %105 = vector.broadcast %78 : vector<8x1xf32> to vector<8x256xf32>
    %106 = arith.mulf %105, %103 : vector<8x256xf32>
    %107 = vector.broadcast %84 : vector<8x1xf32> to vector<8x256xf32>
    %108 = arith.mulf %107, %104 : vector<8x256xf32>
    %109 = arith.addf %106, %108 : vector<8x256xf32>
    %110 = vector.broadcast %88 : vector<8x1xf32> to vector<8x256xf32>
    %111 = arith.addf %109, %110 : vector<8x256xf32>
    %c1_36 = arith.constant 1 : index
    %c0_37 = arith.constant 0 : index
    %c0_38 = arith.constant 0 : index
    %112 = vector.load %arg3[%c1_36, %c0_37, %c0_38] : memref<2x8x256xf32, #tpu.memory_space<vmem>>, vector<1x8x256xf32>
    %113 = vector.shape_cast %112 : vector<1x8x256xf32> to vector<8x256xf32>
    %114 = vector.shape_cast %111 : vector<8x256xf32> to vector<1x8x256xf32>
    tpu.vector_store %arg3[%c1_36, %c0_37, %c0_38], %114 {strides = array<i32>} : memref<2x8x256xf32, #tpu.memory_space<vmem>>, vector<1x8x256xf32>,
    %cst_39 = arith.constant 0.000000e+00 : f32
    %115 = vector.broadcast %cst_39 : f32 to vector<8x5xf32>
    %116 = tpu.concatenate %36, %45, %49, %115 in 1 : vector<8x1xf32>, vector<8x1xf32>, vector<8x1xf32>, vector<8x5xf32> -> vector<8x8xf32>
    %c0_40 = arith.constant 0 : index
    %c0_41 = arith.constant 0 : index
    %117 = vector.load %arg4[%c0_40, %c0_41] : memref<8x8xf32, #tpu.memory_space<vmem>>, vector<8x8xf32>
    tpu.vector_store %arg4[%c0_40, %c0_41], %116 {strides = array<i32>} : memref<8x8xf32, #tpu.memory_space<vmem>>, vector<8x8xf32>,
    return
  }
  func.func @transform_0(%arg0: i32) -> (i32, i32) {
    %c0_i32 = arith.constant 0 : i32
    %c0_i32_0 = arith.constant 0 : i32
    %c0_i32_1 = arith.constant 0 : i32
    return %c0_i32, %c0_i32_0 : i32, i32
  }
  func.func @transform_1(%arg0: i32) -> (i32, i32, i32) {
    %c0_i32 = arith.constant 0 : i32
    %c0_i32_0 = arith.constant 0 : i32
    %c0_i32_1 = arith.constant 0 : i32
    %c0_i32_2 = arith.constant 0 : i32
    return %c0_i32, %c0_i32_0, %c0_i32_1 : i32, i32, i32
  }
  func.func @transform_2(%arg0: i32) -> (i32, i32, i32) {
    %c0_i32 = arith.constant 0 : i32
    %c0_i32_0 = arith.constant 0 : i32
    %c0_i32_1 = arith.constant 0 : i32
    %c0_i32_2 = arith.constant 0 : i32
    return %c0_i32, %c0_i32_0, %c0_i32_1 : i32, i32, i32
  }
  func.func @transform_3(%arg0: i32) -> (i32, i32) {
    %c0_i32 = arith.constant 0 : i32
    %c0_i32_0 = arith.constant 0 : i32
    %c0_i32_1 = arith.constant 0 : i32
    return %c0_i32, %c0_i32_0 : i32, i32
  }
}

</mosaic_0001>

<bundles_post_ra>
// kernel: tpu_custom_call.1
= control target key start
LH: loop header
LB: loop body
LE: loop exit
PB: predicated region body
PF: predicated region fallthrough
CT: control target
= control target key end

     0   :  { %9 = vsyncpa [#allocation3], 0  ;;  %s527_s0 = inlined_call_operand.hbm [shape: f32[8,8], index: 0, kind: input, shape index: {}]   ;;  %s528_s1 = inlined_call_operand.hbm [shape: f32[2,8,256], index: 1, kind: input, shape index: {}]   ;;  %s529_s2 = inlined_call_operand.hbm [shape: f32[2,8,256], index: 2, kind: output, shape index: {0}]   ;;  %s530_s3 = inlined_call_operand.hbm [shape: f32[8,8], index: 3, kind: output, shape index: {1}]  }
   0x1   :  { %10 = vsyncpa [#allocation6], 0 }
   0x2   :  { %11 = vsyncpa [#allocation4], 0 }
   0x3   :  { %12 = vsyncpa [#allocation9], 0  ;;  %s369_s12 = smov [#allocation2]   ;;  %s370_s14 = smov [#allocation5]  }
   0x4   :  { %s19_s13 = sshll.u32 %s369_s12, 4  ;;  %s28_s15 = sshll.u32 %s370_s14, 4  ;;  %s20_s13 = int_to_ptr.vmem [resolvable:$true] %s19_s13  ;;  %s400_s15 = int_to_ptr.vmem [resolvable:$true] %s28_s15 }
   0x5   :  { %s273_s18 = scalar_lea.hbm %s527_s0, 128 }
   0x6   :  { %p274_p0 = scmp.ne.s32.totalorder %s527_s0, %s273_s18  ;;  %p277_p1 = scmp.lt.u32.totalorder %s273_s18, %s527_s0 }
   0x8   :  { %p279_p2 = pnand %p277_p1, %p274_p0 }
   0xa   :  { %282 = shalt.err (!%p279_p2)
}
   0xb   :  { %s283_s23 = scalar_lea.vmem %s20_s13, 128  ;;  %p288_p4 = scmp.lt.s32.totalorder %s20_s13, %s20_s13 }
   0xc   :  { %p284_p3 = scmp.ne.s32.totalorder %s20_s13, %s283_s23  ;;  %p289_p5 = scmp.lt.s32.totalorder %s283_s23, %s283_s23 }
   0xe   :  { %p290_p6 = por %p289_p5, %p288_p4 }
  0x10   :  { %p291_p7 = pnand %p290_p6, %p284_p3 }
  0x12   :  { %294 = shalt.err (!%p291_p7)
}
  0x13   :  { %22 = dma.hbm_to_vmem [thread:$0]  %s527_s0, 128, %s20_s13, [#allocation3]  }
  0x14   :  { %s295_s28 = scalar_lea.hbm %s528_s1, 512 }
  0x15   :  { %p296_p8 = scmp.ne.s32.totalorder %s528_s1, %s295_s28  ;;  %p299_p9 = scmp.lt.u32.totalorder %s295_s28, %s528_s1 }
  0x17   :  { %p301_p10 = pnand %p299_p9, %p296_p8 }
  0x19   :  { %304 = shalt.err (!%p301_p10)
}
  0x1a   :  { %s305_s6 = scalar_lea.vmem %s400_s15, 512  ;;  %p310_p12 = scmp.lt.s32.totalorder %s400_s15, %s400_s15 }
  0x1b   :  { %p306_p11 = scmp.ne.s32.totalorder %s400_s15, %s305_s6  ;;  %p311_p13 = scmp.lt.s32.totalorder %s305_s6, %s305_s6 }
  0x1d   :  { %p312_p0 = por %p311_p13, %p310_p12 }
  0x1f   :  { %p313_p1 = pnand %p312_p0, %p306_p11 }
  0x21   :  { %316 = shalt.err (!%p313_p1)
}
  0x22   :  { %s371_s0 = smov 256   ;;  %s372_s7 = smov 16  }
  0x23   :  { %34 = dma.hbm_to_vmem [thread:$0]  %s528_s1, 512, %s400_s15, [#allocation6], %s371_s0, %s371_s0, %s372_s7  }
  0x24   :  { %361 = dma.done.wait [#allocation3], 128  }
  0x25   :  { %362 = vsyncadd [#allocation3], 4294967168 }
  0x26   :  { %363 = dma.done.wait [#allocation6], 512  }
  0x27   :  { %364 = vsyncadd [#allocation6], 4294966784  ;;  %v434_v0 = vld [vmem:[#allocation5] sm:$0xff]  ;;  %v436_v1 = vld [vmem:[#allocation5 + $0x8] sm:$0xff]  ;;  %s373_s1 = smov 1   ;;  %s375_s10 = smov 127  }
  0x28   :  { %v438_v2 = vld [vmem:[#allocation5 + $0x10] sm:$0xff]  ;;  %v45_v3 = vadd.f32 %v436_v1, %v434_v0  ;;  %v49_v4 = vmul.f32 %v434_v0, %v434_v0  ;;  %v50_v5 = vmul.f32 %v436_v1, %v436_v1  ;;  %v446_v6 = vld [vmem:[#allocation5 + $0x18] sm:$0xff]  ;;  %v43_v13 = vrot.slane %v434_v0, 4  ;;  %s376_s11 = smov 2   ;;  %s378_s12 = smov [#allocation8]  }
  0x29   :  { %v70_v7 = vmul.f32 %v438_v2, %v438_v2  ;;  %v71_v8 = vmul.f32 %v446_v6, %v446_v6  ;;  %v64_v9 = vrot.slane %v438_v2, 4  ;;  %v65_v10 = vrot.slane %v446_v6, 4  ;;  %s238_s13 = sshll.u32 %s378_s12, 4  ;;  %s239_s13 = int_to_ptr.vmem [resolvable:$true] %s238_s13 }
  0x2a   :  { %46 = vadd.xlane.f32.xlu0 %v45_v3  ;;  %v51_v11 = vadd.f32 %v50_v5, %v49_v4  ;;  %v66_v12 = vadd.f32 %v446_v6, %v438_v2  ;;  %v44_v14 = vrot.slane %v436_v1, 4  ;;  %v55_v18 = vmul.f32 %v43_v13, %v434_v0  ;;  %s317_s14 = scalar_lea.vmem %s239_s13, 128  ;;  %p322_p3 = scmp.lt.s32.totalorder %s239_s13, %s239_s13 }
  0x2b   :  { %v72_v15 = vadd.f32 %v71_v8, %v70_v7  ;;  %v76_v16 = vmul.f32 %v64_v9, %v438_v2  ;;  %v77_v17 = vmul.f32 %v65_v10, %v446_v6  ;;  %v374_v7 = vmov 0   ;;  %v82_v8 = vld [vmem:[#allocation2] sm:$0xff]  ;;  %p318_p2 = scmp.ne.s32.totalorder %s239_s13, %s317_s14  ;;  %p323_p4 = scmp.lt.s32.totalorder %s317_s14, %s317_s14 }
  0x2c   :  { %52 = vadd.xlane.f32.xlu1 %v51_v11  ;;  %v56_v19 = vmul.f32 %v44_v14, %v436_v1  ;;  %263 = vset.pattern.permute.xlu0 %v374_v7  ;;  %vm212_vm4 = vcmask 7168   ;;  %vm214_vm5 = vcmask 15360   ;;  %vm216_vm6 = vcmask 23552  }
  0x2d   :  { %v78_v21 = vadd.f32 %v77_v17, %v76_v16  ;;  %264 = vset.pattern.permute.xlu1 %v374_v7  ;;  %vm218_vm7 = vcmask 64512   ;;  %p324_p5 = por %p323_p4, %p322_p3 }
  0x2e   :  { %67 = vadd.xlane.f32.xlu0 %v66_v12  ;;  %v57_v20 = vadd.f32 %v56_v19, %v55_v18 }
  0x2f   :  { %p325_p6 = pnand %p324_p5, %p318_p2 }
  0x30   :  { %73 = vadd.xlane.f32.xlu1 %v72_v15 }
  0x32   :  { %58 = vadd.xlane.f32.xlu0 %v57_v20 }
  0x34   :  { %79 = vadd.xlane.f32.xlu1 %v78_v21 }
  0xb7   :  { %v47_v22 = vpop.xlane.xlu0 %46 }
  0xb9   :  { %v53_v23 = vpop.xlane.xlu1 %52 }
  0xbb   :  { %v68_v24 = vpop.xlane.xlu0 %67 }
  0xbc   :  { %v69_v25 = vadd.f32 %v68_v24, %v47_v22 }
  0xbd   :  { %v74_v26 = vpop.xlane.xlu1 %73 }
  0xbe   :  { %v470_v27 = vmul.f32 0.001953125, %v69_v25  ;;  %v75_v28 = vadd.f32 %v74_v26, %v53_v23  ;;  %v377_v25 = vmov 2  }
  0xbf   :  { %v59_v29 = vpop.xlane.xlu0 %58 }
  0xc0   :  { %v89_v30 = vmul.f32 0.001953125, %v75_v28  ;;  %v90_v31 = vmul.f32 %v470_v27, %v470_v27  ;;  %v85_v32 = vrot.slane %v470_v27, 4 }
  0xc1   :  { %v80_v33 = vpop.xlane.xlu1 %79 }
  0xc2   :  { %v91_v34 = vsub.f32 %v89_v30, %v90_v31  ;;  %v81_v35 = vadd.f32 %v80_v33, %v59_v29  ;;  %v94_v37 = vmul.f32 %v85_v32, %v470_v27 }
  0xc4   :  { %v475_v36 = vadd.f32 0.0001, %v91_v34  ;;  %v93_v38 = vmul.f32 0.001953125, %v81_v35 }
  0xc6   :  { %v97_v39 = vrot.slane %v475_v36, 4  ;;  %v95_v40 = vsub.f32 %v93_v38, %v94_v37 }
  0xc8   :  { %v101_v41 = vmul.f32 %v97_v39, %v475_v36  ;;  %v102_v42 = vmul.f32 %v95_v40, %v95_v40  ;;  %v100_v50 = vadd.f32 %v97_v39, %v475_v36  ;;  %v128_v61 = vsub.f32 0.0, %v95_v40 }
  0xca   :  { %v103_v43 = vsub.f32 %v101_v41, %v102_v42 }
  0xcc   :  { %v104_v44 = vadd.f32 1.1920929e-07, %v103_v43 }
  0xce   :  { %267 = vrsqrt.f32 %v104_v44  ;;  %vm107_vm0 = vcmp.eq.f32.partialorder %v104_v44, inf  ;;  %v110_v47 = vand.u32 2147483648, %v104_v44  ;;  %vm109_vm1 = vcmp.eq.f32.partialorder %v104_v44, 0.0 }
  0xd8   :  { %v268_v45 = vpop.eup %267 }
  0xd9   :  { %v106_v46 = vmul.f32 %v268_v45, %v104_v44 }
  0xdb   :  { %v108_v48 = vsel %vm107_vm0, %v104_v44, %v106_v46 }
  0xdc   :  { %v111_v49 = vsel %vm109_vm1, %v110_v47, %v108_v48 }
  0xdd   :  { %v112_v51 = vmul.f32 2.0, %v111_v49  ;;  %v126_v62 = vadd.f32 %v111_v49, %v97_v39 }
  0xdf   :  { %v113_v52 = vadd.f32 %v112_v51, %v100_v50 }
  0xe1   :  { %v114_v53 = vadd.f32 1.1920929e-07, %v113_v52 }
  0xe3   :  { %269 = vrsqrt.f32 %v114_v53  ;;  %vm117_vm2 = vcmp.eq.f32.partialorder %v114_v53, inf  ;;  %v120_v56 = vand.u32 2147483648, %v114_v53  ;;  %vm119_vm3 = vcmp.eq.f32.partialorder %v114_v53, 0.0 }
  0xed   :  { %v270_v54 = vpop.eup %269 }
  0xee   :  { %v116_v55 = vmul.f32 %v270_v54, %v114_v53 }
  0xf0   :  { %v118_v57 = vsel %vm117_vm2, %v114_v53, %v116_v55 }
  0xf1   :  { %v121_v58 = vsel %vm119_vm3, %v120_v56, %v118_v57 }
  0xf2   :  { %v122_v59 = vmul.f32 %v121_v58, %v111_v49 }
  0xf4   :  { %v123_v60 = vadd.f32 1.1920929e-07, %v122_v59 }
  0xf6   :  { %271 = vrcp.f32 %v123_v60 }
 0x100   :  { %v272_v63 = vpop.eup %271 }
 0x101   :  { %v129_v3 = vmul.f32 %v272_v63, %v128_v61  ;;  %v127_v4 = vmul.f32 %v272_v63, %v126_v62 }
 0x103   :  { %132 = vrot.lane.b32.xlu0 %v129_v3, %s373_s1  ;;  %v143_v5 = vrot.slane %v127_v4, 4  ;;  %v130_v17 = vmul.f32 %v127_v4, %v82_v8  ;;  %v141_v21 = vmul.f32 %v129_v3, %v82_v8 }
 0x105   :  { %147 = vrot.lane.b32.xlu1 %v143_v5, %s373_s1 }
 0x175   :  { %v133_v11 = vpop.permute.xlu0 %132 }
 0x176   :  { %v135_v12 = vmul.f32 %v133_v11, %v82_v8 }
 0x177   :  { %v148_v15 = vpop.permute.xlu1 %147 }
 0x178   :  { %137 = vrot.lane.b32.xlu1 %v135_v12, %s375_s10  ;;  %v150_v16 = vmul.f32 %v148_v15, %v82_v8 }
 0x17c   :  { %152 = vrot.lane.b32.xlu1 %v150_v16, %s375_s10 }
 0x1ea   :  { %v138_v18 = vpop.permute.xlu1 %137 }
 0x1eb   :  { %v140_v19 = vadd.f32 %v138_v18, %v130_v17 }
 0x1ed   :  { %v156_v20 = vmul.f32 %v140_v19, %v470_v27 }
 0x1ee   :  { %v153_v22 = vpop.permute.xlu1 %152 }
 0x1ef   :  { %v155_v23 = vadd.f32 %v153_v22, %v141_v21  ;;  %158 = vrot.lane.b32.xlu0 %v156_v20, %s376_s11 }
 0x1f1   :  { %v162_v24 = vmul.f32 %v155_v23, %v85_v32  ;;  %v213_v32 = vsel %vm212_vm4, %v470_v27, %v475_v36 }
 0x1f3   :  { %164 = vrot.lane.b32.xlu1 %v162_v24, %s376_s11  ;;  %170 = vperm.xlu0 %263, %v140_v19  }
 0x1f7   :  { %177 = vperm.xlu1 %264, %v155_v23   ;;  %209 = vrot.lane.b32.xlu0 %v95_v40, %s376_s11 }
 0x1f8   :  { %266 = vset.pattern.permute.xlu0 %v377_v25 }
 0x1fb   :  { %265 = vset.pattern.permute.xlu1 %v377_v25 }
 0x261   :  { %v159_v26 = vpop.permute.xlu0 %158 }
 0x262   :  { %v161_v28 = vsub.f32 %v82_v8, %v159_v26 }
 0x265   :  { %v165_v29 = vpop.permute.xlu1 %164 }
 0x266   :  { %v167_v30 = vsub.f32 %v161_v28, %v165_v29 }
 0x268   :  { %186 = vperm.xlu1 %265, %v167_v30  }
 0x272   :  { %v171_v31 = vpop.permute.xlu0 %170 }
 0x276   :  { %v210_v33 = vpop.permute.xlu0 %209 }
 0x277   :  { %v215_v34 = vsel %vm214_vm5, %v213_v32, %v210_v33 }
 0x278   :  { %v217_v35 = vsel %vm216_vm6, %v215_v34, 0.0 }
 0x279   :  { %219 = vst.msk [vmem:[#allocation8] sm:$0xff] %vm218_vm7, %v217_v35 }
 0x27a   :  { %328 = shalt.err (!%p325_p6)
}
 0x27b   :  { %s329_s17 = scalar_lea.hbm %s530_s3, 128 }
 0x27c   :  { %p330_p7 = scmp.ne.s32.totalorder %s530_s3, %s329_s17  ;;  %p333_p8 = scmp.lt.u32.totalorder %s329_s17, %s530_s3 }
 0x27e   :  { %p335_p9 = pnand %p333_p8, %p330_p7 }
 0x280   :  { %338 = shalt.err (!%p335_p9)
}
 0x281   :  { %241 = dma.vmem_to_hbm [thread:$0]  %s239_s13, 128, %s530_s3, [#allocation9]   ;;  %v178_v27 = vpop.permute.xlu1 %177  ;;  %v173_v40 = vmul.f32 %v171_v31, %v434_v0  ;;  %v174_v41 = vmul.f32 %v171_v31, %v436_v1  ;;  %v197_v42 = vmul.f32 %v171_v31, %v438_v2  ;;  %v198_v43 = vmul.f32 %v171_v31, %v446_v6 }
 0x282   :  { %v180_v36 = vmul.f32 %v178_v27, %v43_v13  ;;  %v181_v37 = vmul.f32 %v178_v27, %v44_v14  ;;  %v199_v38 = vmul.f32 %v178_v27, %v64_v9  ;;  %v200_v39 = vmul.f32 %v178_v27, %v65_v10  ;;  %s379_s3 = smov [#allocation7]  }
 0x283   :  { %s225_s24 = sshll.u32 %s379_s3, 4  ;;  %s226_s24 = int_to_ptr.vmem [resolvable:$true] %s225_s24 }
 0x284   :  { %v182_v13 = vadd.f32 %v180_v36, %v173_v40  ;;  %v183_v44 = vadd.f32 %v181_v37, %v174_v41  ;;  %v201_v45 = vadd.f32 %v199_v38, %v197_v42  ;;  %v202_v14 = vadd.f32 %v200_v39, %v198_v43  ;;  %s339_s25 = scalar_lea.vmem %s226_s24, 512  ;;  %p344_p11 = scmp.lt.s32.totalorder %s226_s24, %s226_s24 }
 0x285   :  { %p340_p10 = scmp.ne.s32.totalorder %s226_s24, %s339_s25  ;;  %p345_p12 = scmp.lt.s32.totalorder %s339_s25, %s339_s25 }
 0x287   :  { %p346_p13 = por %p345_p12, %p344_p11 }
 0x289   :  { %p347_p0 = pnand %p346_p13, %p340_p10 }
 0x2e7   :  { %v187_v46 = vpop.permute.xlu1 %186 }
 0x2e8   :  { %v189_v47 = vadd.f32 %v187_v46, %v182_v13  ;;  %v190_v9 = vadd.f32 %v187_v46, %v183_v44  ;;  %v203_v48 = vadd.f32 %v201_v45, %v187_v46  ;;  %v204_v49 = vadd.f32 %v202_v14, %v187_v46 }
 0x2ea   :  { %191 = vst [vmem:[#allocation7] sm:$0xff] %v189_v47  ;;  %192 = vst [vmem:[#allocation7 + $0x8] sm:$0xff] %v190_v9 }
 0x2eb   :  { %206 = vst [vmem:[#allocation7 + $0x10] sm:$0xff] %v203_v48  ;;  %207 = vst [vmem:[#allocation7 + $0x18] sm:$0xff] %v204_v49 }
 0x2ec   :  { %350 = shalt.err (!%p347_p0)
}
 0x2ed   :  { %s351_s28 = scalar_lea.hbm %s529_s2, 512 }
 0x2ee   :  { %p352_p1 = scmp.ne.s32.totalorder %s529_s2, %s351_s28  ;;  %p355_p2 = scmp.lt.u32.totalorder %s351_s28, %s529_s2 }
 0x2f0   :  { %p357_p3 = pnand %p355_p2, %p352_p1 }
 0x2f2   :  { %360 = shalt.err (!%p357_p3)
}
 0x2f3   :  { %231 = dma.vmem_to_hbm [thread:$0]  %s226_s24, 512, %s529_s2, [#allocation4], %s371_s0, %s371_s0, %s372_s7  }
 0x2f4   :  { %365 = dma.done.wait [#allocation4], 512  }
 0x2f5   :  { %366 = vsyncadd [#allocation4], 4294966784 }
 0x2f6   :  { %367 = dma.done.wait [#allocation9], 128  }
 0x2f7   :  { %368 = vsyncadd [#allocation9], 4294967168 }
 0x2f8   :  { %248 = vsyncpa [#allocation3], 1 }
 0x2f9   :  { %249 = vsyncpa [#allocation6], 1 }
 0x2fa   :  { %250 = vsyncpa [#allocation4], 1 }
 0x2fb   :  { %251 = vsyncpa [#allocation9], 1 }

</bundles_post_ra>
